<compile_context>
chip_gen: v5e
topology: v5e:2x2
jax: 0.10.0
libtpu: 0.0.40
codegen_flags: <defaults>
</compile_context>

<pallas_src>
import functools

import jax
import jax.numpy as jnp
from jax.experimental import pallas as pl
from jax.experimental.pallas import tpu as pltpu


def _round_up(x, m):
    return ((x + m - 1) // m) * m


def _cdiv(a, b):
    return (a + b - 1) // b


def _linear_probe_kernel(b_ref, x_ref, w_ref, o_ref, acc_ref, *, D, TD, mask_tail):
    # b_ref:   (1, 1)   SMEM f32 bias
    # x_ref:   (TB, TD) VMEM activations tile (last block may be partial)
    # w_ref:   (1, TD)  VMEM f32 weight tile (zero-padded past D)
    # o_ref:   (TB, 1)  VMEM output tile (resident across the reduction axis)
    # acc_ref: (TB, 1)  f32 VMEM scratch accumulator
    k = pl.program_id(1)

    @pl.when(k == 0)
    def _():
        acc_ref[...] = jnp.zeros_like(acc_ref)

    # Multiply in f32 (no-op cast for f32 inputs), accumulate partials in f32.
    x = x_ref[...].astype(jnp.float32)

    if mask_tail:
        # Zero out-of-bounds tail lanes of the (possibly partial) last k block.
        # Garbage lanes can be NaN/Inf, and 0-weight does not neutralize them.
        lim = jnp.minimum(D - k * TD, TD)                       # valid lanes in this block
        col = jax.lax.broadcasted_iota(jnp.int32, x.shape, 1)
        x = jnp.where(col < lim, x, 0.0)

    prod = x * w_ref[...]                                        # VPU, broadcast over sublanes
    acc_ref[...] += jnp.sum(prod, axis=-1, keepdims=True)        # lane reduce -> (TB, 1)

    @pl.when(k == pl.num_programs(1) - 1)
    def _():
        # Bias added exactly once, in the finalize step.
        o_ref[...] = (acc_ref[...] + b_ref[0, 0]).astype(o_ref.dtype)


def linear_probe_forward(x, weight, bias, *, tb=512, td=4096):
    """x: (B, ...); weight: (1, D); bias: (1,). Returns squeeze(x2d @ W.T + b)."""
    B = x.shape[0]
    x2d = x.reshape(B, -1)                       # glue: flatten in plain JAX (no copy pass)
    D = x2d.shape[1]
    assert weight.shape[-1] == D

    # Dtype-aware sublane alignment: 8 for 4-byte, 16 for 2-byte, 32 for 1-byte.
    itemsize = jnp.dtype(x2d.dtype).itemsize
    sub = max(8, 32 // max(1, itemsize))

    # Batch tile: clamp to the (aligned) batch, then guarantee >=2 batch tiles
    # when the batch is big enough so the "parallel" axis can feed 2 TensorCores.
    TB = min(tb, _round_up(B, sub))
    if _cdiv(B, TB) < 2 and B >= 2 * sub:
        TB = _round_up(_cdiv(B, 2), sub)

    # Feature tile: multiple of 128 lanes, capped at the (aligned) feature dim.
    TD = min(td, _round_up(D, 128))

    grid = (_cdiv(B, TB), _cdiv(D, TD))          # reduction axis (D) last
    mask_tail = (D % TD) != 0

    # Only the tiny weight row gets zero-padded (so its tail lanes are real 0s).
    Dp_w = grid[1] * TD
    w_row = weight.reshape(1, D).astype(jnp.float32)
    if Dp_w != D:
        w_row = jnp.pad(w_row, ((0, 0), (0, Dp_w - D)))

    bias_smem = jnp.asarray(bias, jnp.float32).reshape(1, 1)

    kernel = functools.partial(_linear_probe_kernel, D=D, TD=TD, mask_tail=mask_tail)

    out = pl.pallas_call(
        kernel,
        out_shape=jax.ShapeDtypeStruct((B, 1), x2d.dtype),
        grid_spec=pltpu.PrefetchScalarGridSpec(
            num_scalar_prefetch=0,
            grid=grid,
            in_specs=[
                pl.BlockSpec(memory_space=pltpu.SMEM),            # bias scalar
                pl.BlockSpec((TB, TD), lambda i, k: (i, k)),      # activations
                pl.BlockSpec((1, TD), lambda i, k: (0, k)),       # weight row
            ],
            out_specs=pl.BlockSpec((TB, 1), lambda i, k: (i, 0)),
            scratch_shapes=[pltpu.VMEM((TB, 1), jnp.float32)],    # f32 accumulator
        ),
        compiler_params=pltpu.CompilerParams(
            # Batch tiles are independent (megacore-shardable); the D axis
            # carries the accumulator so it must stay "arbitrary".
            dimension_semantics=("parallel", "arbitrary"),
            # 2 x 8 MiB double-buffered x tiles + in-kernel f32 temps + weight
            # double-buffer stay well under 48 MiB (<= v7x's 64 MiB VMEM).
            vmem_limit_bytes=48 * 1024 * 1024,
        ),
    )(bias_smem, x2d, w_row)

    return jnp.squeeze(out)                      # matches torch .squeeze()


if __name__ == "__main__":
    key = jax.random.PRNGKey(0)
    kx, kw, kb = jax.random.split(key, 3)

    # Small shapes: batch=8, features (4, 8) -> input_size D = 32
    B, F1, F2 = 8, 4, 8
    D = F1 * F2

    x = jax.random.normal(kx, (B, F1, F2), dtype=jnp.float32)

    # Deterministic init matching nn.Linear's U(-1/sqrt(D), 1/sqrt(D)) scheme
    bound = 1.0 / jnp.sqrt(jnp.float32(D))
    weight = jax.random.uniform(kw, (1, D), jnp.float32, -bound, bound)
    bias = jax.random.uniform(kb, (1,), jnp.float32, -bound, bound)

    y = linear_probe_forward(x, weight, bias)
    y = jax.block_until_ready(y)

    # Reference check in plain JAX
    y_ref = (x.reshape(B, -1) @ weight.T + bias)[:, 0]
    assert y.shape == (B,)
    assert jnp.allclose(y, y_ref, atol=1e-5, rtol=1e-5)

    print("KERNEL_OK")
</pallas_src>

<mosaic_0001>
module attributes {stable_mosaic.version = 11 : i64} {
  func.func @_linear_probe_kernel(%arg0: i32, %arg1: i32, %arg2: memref<1x1xf32, #tpu.memory_space<smem>>, %arg3: memref<8x128xf32, #tpu.memory_space<vmem>>, %arg4: memref<1x128xf32, #tpu.memory_space<vmem>>, %arg5: memref<8x1xf32, #tpu.memory_space<vmem>>, %arg6: memref<8x1xf32, #tpu.memory_space<vmem>>) attributes {dimension_semantics = [#tpu.dimension_semantics<parallel>, #tpu.dimension_semantics<arbitrary>], iteration_bounds = array<i64: 1, 1>, scalar_prefetch = 0 : i64, scratch_operands = 1 : i64, tpu.core_type = #tpu.core_type<tc>, window_params = [{transform_indices = @transform_0, window_bounds = array<i64: 1, 1>}, {transform_indices = @transform_1, window_bounds = array<i64: 8, 128>}, {transform_indices = @transform_2, window_bounds = array<i64: 1, 128>}, {transform_indices = @transform_3, window_bounds = array<i64: 8, 1>}]} {
    %c0_i32 = arith.constant 0 : i32
    %0 = arith.cmpi eq, %arg1, %c0_i32 : i32
    %1 = arith.extui %0 : i1 to i32
    %c0_i32_0 = arith.constant 0 : i32
    %2 = arith.cmpi ne, %1, %c0_i32_0 : i32
    scf.if %2 {
      %cst_12 = arith.constant 0.000000e+00 : f32
      %23 = vector.broadcast %cst_12 : f32 to vector<8x1xf32>
      %c0_13 = arith.constant 0 : index
      %c0_14 = arith.constant 0 : index
      %24 = vector.load %arg6[%c0_13, %c0_14] : memref<8x1xf32, #tpu.memory_space<vmem>>, vector<8x1xf32>
      tpu.vector_store %arg6[%c0_13, %c0_14], %23 {strides = array<i32>} : memref<8x1xf32, #tpu.memory_space<vmem>>, vector<8x1xf32>,
    } else {
    }
    %c0 = arith.constant 0 : index
    %c0_1 = arith.constant 0 : index
    %3 = vector.load %arg3[%c0, %c0_1] : memref<8x128xf32, #tpu.memory_space<vmem>>, vector<8x128xf32>
    %c128_i32 = arith.constant 128 : i32
    %4 = arith.muli %arg1, %c128_i32 : i32
    %c32_i32 = arith.constant 32 : i32
    %5 = arith.subi %c32_i32, %4 : i32
    %c128_i32_2 = arith.constant 128 : i32
    %6 = arith.minsi %5, %c128_i32_2 : i32
    %7 = tpu.iota {dimensions = array<i32: 1>} : vector<8x128xi32>
    %8 = vector.broadcast %6 : i32 to vector<8x128xi32>
    %9 = arith.cmpi slt, %7, %8 : vector<8x128xi32>
    %cst = arith.constant 0.000000e+00 : f32
    %10 = vector.broadcast %cst : f32 to vector<8x128xf32>
    %11 = arith.select %9, %3, %10 : vector<8x128xi1>, vector<8x128xf32>
    %c0_3 = arith.constant 0 : index
    %c0_4 = arith.constant 0 : index
    %12 = vector.load %arg4[%c0_3, %c0_4] : memref<1x128xf32, #tpu.memory_space<vmem>>, vector<1x128xf32>
    %13 = vector.broadcast %12 : vector<1x128xf32> to vector<8x128xf32>
    %14 = arith.mulf %11, %13 : vector<8x128xf32>
    %c0_5 = arith.constant 0 : index
    %c0_6 = arith.constant 0 : index
    %15 = vector.load %arg6[%c0_5, %c0_6] : memref<8x1xf32, #tpu.memory_space<vmem>>, vector<8x1xf32>
    %cst_7 = arith.constant dense<0.000000e+00> : vector<8xf32>
    %16 = vector.multi_reduction <add>, %14, %cst_7 [1] : vector<8x128xf32> to vector<8xf32>
    %17 = vector.shape_cast %16 : vector<8xf32> to vector<8x1xf32>
    %18 = arith.addf %15, %17 : vector<8x1xf32>
    %c0_8 = arith.constant 0 : index
    %c0_9 = arith.constant 0 : index
    %19 = vector.load %arg6[%c0_8, %c0_9] : memref<8x1xf32, #tpu.memory_space<vmem>>, vector<8x1xf32>
    tpu.vector_store %arg6[%c0_8, %c0_9], %18 {strides = array<i32>} : memref<8x1xf32, #tpu.memory_space<vmem>>, vector<8x1xf32>,
    %c0_i32_10 = arith.constant 0 : i32
    %20 = arith.cmpi eq, %arg1, %c0_i32_10 : i32
    %21 = arith.extui %20 : i1 to i32
    %c0_i32_11 = arith.constant 0 : i32
    %22 = arith.cmpi ne, %21, %c0_i32_11 : i32
    scf.if %22 {
      %c0_12 = arith.constant 0 : index
      %c0_13 = arith.constant 0 : index
      %23 = vector.load %arg6[%c0_12, %c0_13] : memref<8x1xf32, #tpu.memory_space<vmem>>, vector<8x1xf32>
      %c0_14 = arith.constant 0 : index
      %c0_15 = arith.constant 0 : index
      %24 = memref.load %arg2[%c0_14, %c0_15] : memref<1x1xf32, #tpu.memory_space<smem>>
      %25 = vector.broadcast %24 : f32 to vector<8x1xf32>
      %26 = arith.addf %23, %25 : vector<8x1xf32>
      %c0_16 = arith.constant 0 : index
      %c0_17 = arith.constant 0 : index
      %27 = vector.load %arg5[%c0_16, %c0_17] : memref<8x1xf32, #tpu.memory_space<vmem>>, vector<8x1xf32>
      tpu.vector_store %arg5[%c0_16, %c0_17], %26 {strides = array<i32>} : memref<8x1xf32, #tpu.memory_space<vmem>>, vector<8x1xf32>,
    } else {
    }
    return
  }
  func.func @transform_0(%arg0: i32, %arg1: i32) -> (i32, i32) {
    %c0_i32 = arith.constant 0 : i32
    %c0_i32_0 = arith.constant 0 : i32
    %c0_i32_1 = arith.constant 0 : i32
    return %c0_i32, %c0_i32_0 : i32, i32
  }
  func.func @transform_1(%arg0: i32, %arg1: i32) -> (i32, i32) {
    %c0_i32 = arith.constant 0 : i32
    return %arg0, %arg1 : i32, i32
  }
  func.func @transform_2(%arg0: i32, %arg1: i32) -> (i32, i32) {
    %c0_i32 = arith.constant 0 : i32
    %c0_i32_0 = arith.constant 0 : i32
    return %c0_i32, %arg1 : i32, i32
  }
  func.func @transform_3(%arg0: i32, %arg1: i32) -> (i32, i32) {
    %c0_i32 = arith.constant 0 : i32
    %c0_i32_0 = arith.constant 0 : i32
    return %arg0, %c0_i32 : i32, i32
  }
}

</mosaic_0001>

<bundles_post_ra>
// kernel: tpu_custom_call.1
= control target key start
LH: loop header
LB: loop body
LE: loop exit
PB: predicated region body
PF: predicated region fallthrough
CT: control target
= control target key end

     0   :  { %9 = vsyncpa [#allocation5], 0  ;;  %s98_s15 = smov [#allocation4]   ;;  %s135_s0 = inlined_call_operand.<no memory space> [shape: f32[1,1], index: 0, kind: input, shape index: {}]   ;;  %s136_s1 = inlined_call_operand.hbm [shape: f32[8,32], index: 1, kind: input, shape index: {}]   ;;  %s137_s2 = inlined_call_operand.vmem [shape: f32[1,128], index: 2, kind: input, shape index: {}]   ;;  %s138_s3 = inlined_call_operand.vmem [shape: f32[8,1], index: 3, kind: output, shape index: {}]  }
   0x1   :  { %s17_s14 = sshll.u32 %s136_s1, 4  ;;  %s19_s16 = sshll.u32 %s98_s15, 4  ;;  %s18_s14 = int_to_ptr.hbm [resolvable:$true] %s17_s14  ;;  %s20_s16 = int_to_ptr.vmem [resolvable:$true] %s19_s16 }
   0x2   :  { %22 = dma.hbm_to_vmem [thread:$0]  %s18_s14, 128, %s20_s16, [#allocation5]  }
   0x3   :  { %96 = dma.done.wait [#allocation5], 128  }
   0x4   :  { %97 = vsyncadd [#allocation5], 4294967168  ;;  %vm33_vm0 = vcmask 7168   ;;  %v40_v0 = vlaneseq  ;;  %v99_v1 = vmov 0.0   ;;  %v35_v3 = vld [vmem:[#allocation4] sm:$0xff]  ;;  %v61_v10 = vstv %s135_s0 }
   0x5   :  { %34 = vst.msk [vmem:[#allocation2] sm:$0xff] %vm33_vm0, %v99_v1  ;;  %v71_v4 = vld [vmem:[%s137_s2] ss:$0 sm:$0xff] }
   0x6   :  { %v41_v2 = vand.u32 127, %v40_v0 }
   0x8   :  { %vm43_vm1 = vcmp.lt.s32.totalorder %v41_v2, 32 }
   0x9   :  { %v44_v5 = vsel %vm43_vm1, %v35_v3, 0.0 }
   0xa   :  { %v49_v6 = vmul.f32 %v71_v4, %v44_v5 }
   0xc   :  { %51 = vadd.xlane.f32.xlu0 %v49_v6  ;;  %v50_v7 = vld [vmem:[#allocation2] sm:$0xff] }
  0x7f   :  { %v52_v8 = vpop.xlane.xlu0 %51 }
  0x80   :  { %v53_v9 = vadd.f32 %v52_v8, %v50_v7 }
  0x82   :  { %55 = vst.msk [vmem:[#allocation2] sm:$0xff] %vm33_vm0, %v53_v9 }
  0x89   :  { %v59_v11 = vld [vmem:[#allocation2] sm:$0xff] }
  0x8a   :  { %v62_v12 = vadd.f32 %v61_v10, %v59_v11 }
  0x8c   :  { %63 = vst.msk [vmem:[%s138_s3] sm:$0xff] %vm33_vm0, %v62_v12 }
  0x8d   :  { %68 = vsyncpa [#allocation5], 1 }

</bundles_post_ra>
